<compile_context>
chip_gen: v5e
topology: v5e:2x2
jax: 0.10.0
libtpu: 0.0.40
codegen_flags: <defaults>
</compile_context>

<pallas_src>
import jax
import jax.numpy as jnp
from jax.experimental import pallas as pl
from jax.experimental.pallas import tpu as pltpu


def _make_kernel(nb, k_split, x_cast_dtype):
    """Build the fused 1x1-conv + BN-shift kernel.

    nb:           images per grid step (static python int, unrolled loop)
    k_split:      whether the C_in reduction is split over grid axis 2
    x_cast_dtype: if not None, cast the x tile to this dtype just before the
                  MXU matmul (f32 accumulation is kept in all cases).
    """
    if not k_split:
        def kernel(x_ref, w_ref, shift_ref, o_ref):
            # x_ref: (nb, C_in, t_hw), w_ref: (C_out, C_in), shift: (C_out, 1)
            # o_ref: (nb, C_out, t_hw)   -- pixels on the lane axis
            w = w_ref[...]
            shift = shift_ref[...]
            for b in range(nb):                     # static unroll
                x = x_ref[b]
                if x_cast_dtype is not None:
                    x = x.astype(x_cast_dtype)
                acc = jnp.dot(w, x, preferred_element_type=jnp.float32)
                o_ref[b] = (acc + shift).astype(o_ref.dtype)
        return kernel

    def kernel(x_ref, w_ref, shift_ref, o_ref, acc_ref):
        # C_in split over grid axis 2, accumulated in an f32 VMEM scratch.
        k = pl.program_id(2)

        @pl.when(k == 0)
        def _():
            acc_ref[...] = jnp.zeros_like(acc_ref)

        w = w_ref[...]
        for b in range(nb):                         # static unroll
            x = x_ref[b]
            if x_cast_dtype is not None:
                x = x.astype(x_cast_dtype)
            acc_ref[b] += jnp.dot(w, x, preferred_element_type=jnp.float32)

        @pl.when(k == pl.num_programs(2) - 1)
        def _():
            o_ref[...] = (acc_ref[...] + shift_ref[...]).astype(o_ref.dtype)

    return kernel


def _vmem_caps():
    """(physical VMEM bytes, working budget bytes) for the current chip."""
    try:
        phys = int(pltpu.get_tpu_info().vmem_capacity_bytes)
    except Exception:
        phys = 64 * 2**20          # conservative default (v7x-sized VMEM)
    if phys <= 64 * 2**20:
        budget = 48 * 2**20        # v7x: leave headroom for Mosaic scratch
    else:
        budget = min(100 * 2**20, (phys * 3) // 4)   # v5e / v6e: 128 MiB parts
    return phys, budget


def pointwise_conv_bn(x_nchw, weight, gamma, beta, running_mean, running_var,
                      eps=1e-5, *, t_hw=None, t_cin=None, nb=None,
                      matmul_dtype=None):
    """Fused 1x1 Conv2d (bias=False) + BatchNorm2d (inference) on TPU.

    x_nchw: (N, C_in, H, W); weight: (C_out, C_in, 1, 1).
    Returns (N, C_out, H, W) in x_nchw.dtype.  Keyword args override the
    automatic tiling (used for testing specific code paths).
    """
    N, C_in, H, W = x_nchw.shape
    C_out = weight.shape[0]
    HW = H * W
    out_dtype = x_nchw.dtype

    # ---- fold BN (inference semantics) into weight + per-channel shift (f32)
    scale = (gamma.astype(jnp.float32)
             / jnp.sqrt(running_var.astype(jnp.float32) + eps))
    shift = (beta.astype(jnp.float32)
             - running_mean.astype(jnp.float32) * scale).reshape(C_out, 1)
    w_mat = weight.reshape(C_out, C_in).astype(jnp.float32) * scale[:, None]

    # ---- matmul operand dtype: in-kernel x cast, never a wrapper-side pass --
    if matmul_dtype is None:
        if x_nchw.dtype == jnp.bfloat16:
            matmul_dtype = jnp.bfloat16
        elif C_in >= 256 and C_out >= 256:
            # compute-bound regime: bf16 MXU inputs, f32 accumulation
            matmul_dtype = jnp.bfloat16
    w_k = w_mat if matmul_dtype is None else w_mat.astype(matmul_dtype)
    x_cast_dtype = (matmul_dtype
                    if (matmul_dtype is not None
                        and x_nchw.dtype != matmul_dtype)
                    else None)

    # contiguous reshape only (no transpose): (N, C_in, H*W)
    x3 = x_nchw.reshape(N, C_in, HW)

    x_isz = jnp.dtype(x3.dtype).itemsize
    o_isz = jnp.dtype(out_dtype).itemsize
    w_isz = jnp.dtype(w_k.dtype).itemsize

    phys_vmem, budget = _vmem_caps()
    t_hw_arg, t_cin_arg, nb_arg = t_hw, t_cin, nb

    def _attempt(single_buffer_resident):
        w_bufs = 1 if single_buffer_resident else 2

        # -- reduction (C_in) split: keep the resident weight within budget ---
        k_split = False
        t_cin = C_in
        if C_out * C_in * w_isz > budget // 3:
            for cand in (4096, 2048, 1024, 512, 256, 128):
                if (cand < C_in and C_in % cand == 0
                        and C_out * cand * w_isz <= budget // 3):
                    t_cin, k_split = cand, True
                    break
        if t_cin_arg is not None:
            if (t_cin_arg == C_in
                    or (C_in % t_cin_arg == 0 and t_cin_arg % 128 == 0)):
                t_cin = int(t_cin_arg)
                k_split = t_cin < C_in

        # weight block index varies with k when k-split -> keep its prefetch
        w_pipeline_bufs = 2 if k_split else w_bufs
        fixed = (w_pipeline_bufs * C_out * t_cin * w_isz   # weight
                 + 2 * C_out * 4                           # shift
                 + (2 << 20))                              # Mosaic slack

        def lane_bytes(nb_):
            return (2 * nb_ * t_cin * x_isz                # double-buffered x
                    + 2 * nb_ * C_out * o_isz              # double-buffered out
                    + (4 * nb_ * C_out if k_split else 0)) # f32 accumulator

        # -- images per grid step (amortize per-step overhead for small HW) ---
        if nb_arg is not None:
            nb = max(1, min(int(nb_arg), N))
            while N % nb:
                nb -= 1
        elif HW < 512 and N > 1:
            nb = 1
            target = max(1, 1024 // max(HW, 1))
            for cand in range(min(N, target), 1, -1):
                if N % cand == 0 and fixed + lane_bytes(cand) * HW <= budget:
                    nb = cand
                    break
        else:
            nb = 1

        # -- pixel (lane) tile from the VMEM budget ---------------------------
        if t_hw_arg is not None:
            t_hw = int(min(HW, max(1, t_hw_arg)))
            if t_hw != HW:
                t_hw = max(128, (t_hw // 128) * 128)
        else:
            avail = budget - fixed
            cap = avail // lane_bytes(nb) if avail > 0 else 128
            cap = int(min(max(cap, 128), 65536))
            if HW <= cap:
                t_hw = HW
            else:
                t_hw = (cap // 128) * 128
                # prefer a 128-multiple divisor of HW (no masked ragged tail),
                # as long as it costs at most 2x in tile size
                c = t_hw
                while c >= max(128, t_hw // 2):
                    if HW % c == 0:
                        t_hw = c
                        break
                    c -= 128

        # -- keep >= 2 parallel grid steps (v7x has 2 TensorCores per chip) ---
        if ((N // nb) * (-(-HW // t_hw)) == 1
                and N * C_out * HW >= (1 << 18)):
            if N >= 2:
                nb2 = N // 2
                while nb2 > 1 and N % nb2:
                    nb2 -= 1
                nb = max(1, nb2)
            elif HW >= 256:
                half = -(-HW // 2)
                t_hw = min(HW, max(128, (-(-half // 128)) * 128))

        n_b = N // nb
        n_p = -(-HW // t_hw)
        n_k = C_in // t_cin if k_split else 1

        need = fixed + lane_bytes(nb) * t_hw + (2 << 20)
        vmem_limit = int(min(phys_vmem, max(32 * 2**20, need)))

        resident = ({"pipeline_mode": pl.Buffered(1)}
                    if single_buffer_resident else {})

        if k_split:
            grid = (n_b, n_p, n_k)
            dims = ("parallel", "parallel", "arbitrary")
            x_spec = pl.BlockSpec((nb, t_cin, t_hw), lambda n, p, k: (n, k, p))
            w_spec = pl.BlockSpec((C_out, t_cin), lambda n, p, k: (0, k))
            s_spec = pl.BlockSpec((C_out, 1), lambda n, p, k: (0, 0), **resident)
            o_spec = pl.BlockSpec((nb, C_out, t_hw), lambda n, p, k: (n, 0, p))
            scratch = [pltpu.VMEM((nb, C_out, t_hw), jnp.float32)]
        else:
            grid = (n_b, n_p)
            dims = ("parallel", "parallel")
            x_spec = pl.BlockSpec((nb, C_in, t_hw), lambda n, p: (n, 0, p))
            w_spec = pl.BlockSpec((C_out, C_in), lambda n, p: (0, 0), **resident)
            s_spec = pl.BlockSpec((C_out, 1), lambda n, p: (0, 0), **resident)
            o_spec = pl.BlockSpec((nb, C_out, t_hw), lambda n, p: (n, 0, p))
            scratch = []

        kernel = _make_kernel(nb, k_split, x_cast_dtype)

        return pl.pallas_call(
            kernel,
            out_shape=jax.ShapeDtypeStruct((N, C_out, HW), out_dtype),
            grid_spec=pltpu.PrefetchScalarGridSpec(
                num_scalar_prefetch=0,
                grid=grid,
                in_specs=[x_spec, w_spec, s_spec],
                out_specs=o_spec,
                scratch_shapes=scratch),
            compiler_params=pltpu.CompilerParams(
                dimension_semantics=dims,
                vmem_limit_bytes=vmem_limit),
        )(x3, w_k, shift)

    try:
        out3 = _attempt(True)
    except Exception:
        # pl.Buffered(1) (single-buffered resident operands) rejected by this
        # JAX/Mosaic version -> fall back to default double buffering.
        out3 = _attempt(False)

    return out3.reshape(N, C_out, H, W)


def _reference(x, weight, gamma, beta, mean, var, eps=1e-5):
    C_out, C_in = weight.shape[0], weight.shape[1]
    y = jnp.einsum('nchw,oc->nohw', x, weight.reshape(C_out, C_in))
    y = (y - mean[None, :, None, None]) / jnp.sqrt(var[None, :, None, None] + eps)
    return y * gamma[None, :, None, None] + beta[None, :, None, None]


if __name__ == "__main__":
    key = jax.random.PRNGKey(0)
    ks = jax.random.split(key, 8)

    # ---- test 1: spec-sized shapes (batch-blocking path, resident weight) ---
    N, C_in, C_out, H, W = 2, 4, 8, 16, 16
    x = jax.random.normal(ks[0], (N, C_in, H, W), dtype=jnp.float32)
    bound = 1.0 / jnp.sqrt(jnp.float32(C_in))
    weight = jax.random.uniform(ks[1], (C_out, C_in, 1, 1),
                                minval=-bound, maxval=bound, dtype=jnp.float32)
    gamma = jax.random.uniform(ks[2], (C_out,), minval=0.5, maxval=1.5)
    beta = jax.random.normal(ks[3], (C_out,)) * 0.1
    running_mean = jax.random.normal(ks[4], (C_out,)) * 0.1
    running_var = jax.random.uniform(ks[5], (C_out,), minval=0.5, maxval=1.5)

    out = pointwise_conv_bn(x, weight, gamma, beta, running_mean, running_var)
    out = jax.block_until_ready(out)
    ref = _reference(x, weight, gamma, beta, running_mean, running_var)
    assert out.shape == (N, C_out, H, W)
    assert jnp.allclose(out, ref, atol=1e-3, rtol=1e-3), \
        float(jnp.max(jnp.abs(out - ref)))

    # ---- test 2: forced C_in (reduction) k-split path ------------------------
    N2, C_in2, C_out2, H2, W2 = 1, 256, 16, 16, 16
    x2 = jax.random.normal(ks[6], (N2, C_in2, H2, W2), dtype=jnp.float32)
    bound2 = 1.0 / jnp.sqrt(jnp.float32(C_in2))
    weight2 = jax.random.uniform(ks[7], (C_out2, C_in2, 1, 1),
                                 minval=-bound2, maxval=bound2, dtype=jnp.float32)
    gamma2 = jnp.ones((C_out2,), jnp.float32)
    beta2 = jnp.zeros((C_out2,), jnp.float32)
    mean2 = jnp.zeros((C_out2,), jnp.float32)
    var2 = jnp.ones((C_out2,), jnp.float32)

    out2 = pointwise_conv_bn(x2, weight2, gamma2, beta2, mean2, var2,
                             t_cin=128)      # force the k-split code path
    out2 = jax.block_until_ready(out2)
    ref2 = _reference(x2, weight2, gamma2, beta2, mean2, var2)
    assert out2.shape == (N2, C_out2, H2, W2)
    assert jnp.allclose(out2, ref2, atol=1e-3, rtol=1e-3), \
        float(jnp.max(jnp.abs(out2 - ref2)))

    print("KERNEL_OK")
</pallas_src>

<mosaic_0001>
module attributes {stable_mosaic.version = 11 : i64} {
  func.func @kernel(%arg0: i32, %arg1: i32, %arg2: memref<2x4x256xf32, #tpu.memory_space<vmem>>, %arg3: memref<8x4xf32, #tpu.memory_space<vmem>>, %arg4: memref<8x1xf32, #tpu.memory_space<vmem>>, %arg5: memref<2x8x256xf32, #tpu.memory_space<vmem>>) attributes {dimension_semantics = [#tpu.dimension_semantics<parallel>, #tpu.dimension_semantics<parallel>], iteration_bounds = array<i64: 1, 1>, scalar_prefetch = 0 : i64, scratch_operands = 0 : i64, tpu.core_type = #tpu.core_type<tc>, window_params = [{transform_indices = @transform_0, window_bounds = array<i64: 2, 4, 256>}, {pipeline_mode = #tpu.pipeline_mode<synchronous>, transform_indices = @transform_1, window_bounds = array<i64: 8, 4>}, {pipeline_mode = #tpu.pipeline_mode<synchronous>, transform_indices = @transform_2, window_bounds = array<i64: 8, 1>}, {transform_indices = @transform_3, window_bounds = array<i64: 2, 8, 256>}]} {
    %c0 = arith.constant 0 : index
    %c0_0 = arith.constant 0 : index
    %0 = vector.load %arg3[%c0, %c0_0] : memref<8x4xf32, #tpu.memory_space<vmem>>, vector<8x4xf32>
    %c0_1 = arith.constant 0 : index
    %c0_2 = arith.constant 0 : index
    %1 = vector.load %arg4[%c0_1, %c0_2] : memref<8x1xf32, #tpu.memory_space<vmem>>, vector<8x1xf32>
    %c0_3 = arith.constant 0 : index
    %c0_4 = arith.constant 0 : index
    %c0_5 = arith.constant 0 : index
    %2 = vector.load %arg2[%c0_3, %c0_4, %c0_5] : memref<2x4x256xf32, #tpu.memory_space<vmem>>, vector<1x4x256xf32>
    %3 = vector.shape_cast %2 : vector<1x4x256xf32> to vector<4x256xf32>
    %cst = arith.constant dense<0.000000e+00> : vector<8x256xf32>
    %4 = tpu.matmul %0, %3, %cst {dimension_numbers = #tpu.dot_dimension_numbers<[1], [0], [0], [1], [0, 0, 1, 1], [], []>} : vector<8x4xf32>, vector<4x256xf32>, vector<8x256xf32> -> vector<8x256xf32>
    %5 = vector.broadcast %1 : vector<8x1xf32> to vector<8x256xf32>
    %6 = arith.addf %4, %5 : vector<8x256xf32>
    %c0_6 = arith.constant 0 : index
    %c0_7 = arith.constant 0 : index
    %c0_8 = arith.constant 0 : index
    %7 = vector.load %arg5[%c0_6, %c0_7, %c0_8] : memref<2x8x256xf32, #tpu.memory_space<vmem>>, vector<1x8x256xf32>
    %8 = vector.shape_cast %7 : vector<1x8x256xf32> to vector<8x256xf32>
    %9 = vector.shape_cast %6 : vector<8x256xf32> to vector<1x8x256xf32>
    tpu.vector_store %arg5[%c0_6, %c0_7, %c0_8], %9 {strides = array<i32>} : memref<2x8x256xf32, #tpu.memory_space<vmem>>, vector<1x8x256xf32>,
    %c1 = arith.constant 1 : index
    %c0_9 = arith.constant 0 : index
    %c0_10 = arith.constant 0 : index
    %10 = vector.load %arg2[%c1, %c0_9, %c0_10] : memref<2x4x256xf32, #tpu.memory_space<vmem>>, vector<1x4x256xf32>
    %11 = vector.shape_cast %10 : vector<1x4x256xf32> to vector<4x256xf32>
    %cst_11 = arith.constant dense<0.000000e+00> : vector<8x256xf32>
    %12 = tpu.matmul %0, %11, %cst_11 {dimension_numbers = #tpu.dot_dimension_numbers<[1], [0], [0], [1], [0, 0, 1, 1], [], []>} : vector<8x4xf32>, vector<4x256xf32>, vector<8x256xf32> -> vector<8x256xf32>
    %13 = vector.broadcast %1 : vector<8x1xf32> to vector<8x256xf32>
    %14 = arith.addf %12, %13 : vector<8x256xf32>
    %c1_12 = arith.constant 1 : index
    %c0_13 = arith.constant 0 : index
    %c0_14 = arith.constant 0 : index
    %15 = vector.load %arg5[%c1_12, %c0_13, %c0_14] : memref<2x8x256xf32, #tpu.memory_space<vmem>>, vector<1x8x256xf32>
    %16 = vector.shape_cast %15 : vector<1x8x256xf32> to vector<8x256xf32>
    %17 = vector.shape_cast %14 : vector<8x256xf32> to vector<1x8x256xf32>
    tpu.vector_store %arg5[%c1_12, %c0_13, %c0_14], %17 {strides = array<i32>} : memref<2x8x256xf32, #tpu.memory_space<vmem>>, vector<1x8x256xf32>,
    return
  }
  func.func @transform_0(%arg0: i32, %arg1: i32) -> (i32, i32, i32) {
    %c0_i32 = arith.constant 0 : i32
    %c0_i32_0 = arith.constant 0 : i32
    return %arg0, %c0_i32, %arg1 : i32, i32, i32
  }
  func.func @transform_1(%arg0: i32, %arg1: i32) -> (i32, i32) {
    %c0_i32 = arith.constant 0 : i32
    %c0_i32_0 = arith.constant 0 : i32
    %c0_i32_1 = arith.constant 0 : i32
    return %c0_i32, %c0_i32_0 : i32, i32
  }
  func.func @transform_2(%arg0: i32, %arg1: i32) -> (i32, i32) {
    %c0_i32 = arith.constant 0 : i32
    %c0_i32_0 = arith.constant 0 : i32
    %c0_i32_1 = arith.constant 0 : i32
    return %c0_i32, %c0_i32_0 : i32, i32
  }
  func.func @transform_3(%arg0: i32, %arg1: i32) -> (i32, i32, i32) {
    %c0_i32 = arith.constant 0 : i32
    %c0_i32_0 = arith.constant 0 : i32
    return %arg0, %c0_i32, %arg1 : i32, i32, i32
  }
}

module attributes {stable_mosaic.version = 11 : i64} {
  func.func @kernel(%arg0: i32, %arg1: i32, %arg2: memref<2x4x256xf32, #tpu.memory_space<vmem>>, %arg3: memref<8x4xf32, #tpu.memory_space<vmem>>, %arg4: memref<8x1xf32, #tpu.memory_space<vmem>>, %arg5: memref<2x8x256xf32, #tpu.memory_space<vmem>>) attributes {dimension_semantics = [#tpu.dimension_semantics<parallel>, #tpu.dimension_semantics<parallel>], iteration_bounds = array<i64: 1, 1>, scalar_prefetch = 0 : i64, scratch_operands = 0 : i64, tpu.core_type = #tpu.core_type<tc>, window_params = [{transform_indices = @transform_0, window_bounds = array<i64: 2, 4, 256>}, {pipeline_mode = #tpu.pipeline_mode<synchronous>, transform_indices = @transform_1, window_bounds = array<i64: 8, 4>}, {pipeline_mode = #tpu.pipeline_mode<synchronous>, transform_indices = @transform_2, window_bounds = array<i64: 8, 1>}, {transform_indices = @transform_3, window_bounds = array<i64: 2, 8, 256>}]} {
    %c0 = arith.constant 0 : index
    %c0_0 = arith.constant 0 : index
    %0 = vector.load %arg3[%c0, %c0_0] : memref<8x4xf32, #tpu.memory_space<vmem>>, vector<8x4xf32>
    %c0_1 = arith.constant 0 : index
    %c0_2 = arith.constant 0 : index
    %1 = vector.load %arg4[%c0_1, %c0_2] : memref<8x1xf32, #tpu.memory_space<vmem>>, vector<8x1xf32>
    %c0_3 = arith.constant 0 : index
    %c0_4 = arith.constant 0 : index
    %c0_5 = arith.constant 0 : index
    %2 = vector.load %arg2[%c0_3, %c0_4, %c0_5] : memref<2x4x256xf32, #tpu.memory_space<vmem>>, vector<1x4x256xf32>
    %3 = vector.shape_cast %2 : vector<1x4x256xf32> to vector<4x256xf32>
    %cst = arith.constant dense<0.000000e+00> : vector<8x256xf32>
    %4 = tpu.matmul %0, %3, %cst {dimension_numbers = #tpu.dot_dimension_numbers<[1], [0], [0], [1], [0, 0, 1, 1], [], []>} : vector<8x4xf32>, vector<4x256xf32>, vector<8x256xf32> -> vector<8x256xf32>
    %5 = vector.broadcast %1 : vector<8x1xf32> to vector<8x256xf32>
    %6 = arith.addf %4, %5 : vector<8x256xf32>
    %c0_6 = arith.constant 0 : index
    %c0_7 = arith.constant 0 : index
    %c0_8 = arith.constant 0 : index
    %7 = vector.load %arg5[%c0_6, %c0_7, %c0_8] : memref<2x8x256xf32, #tpu.memory_space<vmem>>, vector<1x8x256xf32>
    %8 = vector.shape_cast %7 : vector<1x8x256xf32> to vector<8x256xf32>
    %9 = vector.shape_cast %6 : vector<8x256xf32> to vector<1x8x256xf32>
    tpu.vector_store %arg5[%c0_6, %c0_7, %c0_8], %9 {strides = array<i32>} : memref<2x8x256xf32, #tpu.memory_space<vmem>>, vector<1x8x256xf32>,
    %c1 = arith.constant 1 : index
    %c0_9 = arith.constant 0 : index
    %c0_10 = arith.constant 0 : index
    %10 = vector.load %arg2[%c1, %c0_9, %c0_10] : memref<2x4x256xf32, #tpu.memory_space<vmem>>, vector<1x4x256xf32>
    %11 = vector.shape_cast %10 : vector<1x4x256xf32> to vector<4x256xf32>
    %cst_11 = arith.constant dense<0.000000e+00> : vector<8x256xf32>
    %12 = tpu.matmul %0, %11, %cst_11 {dimension_numbers = #tpu.dot_dimension_numbers<[1], [0], [0], [1], [0, 0, 1, 1], [], []>} : vector<8x4xf32>, vector<4x256xf32>, vector<8x256xf32> -> vector<8x256xf32>
    %13 = vector.broadcast %1 : vector<8x1xf32> to vector<8x256xf32>
    %14 = arith.addf %12, %13 : vector<8x256xf32>
    %c1_12 = arith.constant 1 : index
    %c0_13 = arith.constant 0 : index
    %c0_14 = arith.constant 0 : index
    %15 = vector.load %arg5[%c1_12, %c0_13, %c0_14] : memref<2x8x256xf32, #tpu.memory_space<vmem>>, vector<1x8x256xf32>
    %16 = vector.shape_cast %15 : vector<1x8x256xf32> to vector<8x256xf32>
    %17 = vector.shape_cast %14 : vector<8x256xf32> to vector<1x8x256xf32>
    tpu.vector_store %arg5[%c1_12, %c0_13, %c0_14], %17 {strides = array<i32>} : memref<2x8x256xf32, #tpu.memory_space<vmem>>, vector<1x8x256xf32>,
    return
  }
  func.func @transform_0(%arg0: i32, %arg1: i32) -> (i32, i32, i32) {
    %c0_i32 = arith.constant 0 : i32
    %c0_i32_0 = arith.constant 0 : i32
    return %arg0, %c0_i32, %arg1 : i32, i32, i32
  }
  func.func @transform_1(%arg0: i32, %arg1: i32) -> (i32, i32) {
    %c0_i32 = arith.constant 0 : i32
    %c0_i32_0 = arith.constant 0 : i32
    %c0_i32_1 = arith.constant 0 : i32
    return %c0_i32, %c0_i32_0 : i32, i32
  }
  func.func @transform_2(%arg0: i32, %arg1: i32) -> (i32, i32) {
    %c0_i32 = arith.constant 0 : i32
    %c0_i32_0 = arith.constant 0 : i32
    %c0_i32_1 = arith.constant 0 : i32
    return %c0_i32, %c0_i32_0 : i32, i32
  }
  func.func @transform_3(%arg0: i32, %arg1: i32) -> (i32, i32, i32) {
    %c0_i32 = arith.constant 0 : i32
    %c0_i32_0 = arith.constant 0 : i32
    return %arg0, %c0_i32, %arg1 : i32, i32, i32
  }
}

</mosaic_0001>

<bundles_post_ra>
// kernel: tpu_custom_call.1
= control target key start
LH: loop header
LB: loop body
LE: loop exit
PB: predicated region body
PF: predicated region fallthrough
CT: control target
= control target key end

     0   :  { %v189_v1 = vmov 0   ;;  %s228_s0 = inlined_call_operand.vmem [shape: f32[2,4,256], index: 0, kind: input, shape index: {}]   ;;  %s229_s1 = inlined_call_operand.vmem [shape: f32[8,4], index: 1, kind: input, shape index: {}]   ;;  %s230_s2 = inlined_call_operand.vmem [shape: f32[8,1], index: 2, kind: input, shape index: {}]   ;;  %s231_s3 = inlined_call_operand.hbm [shape: f32[2,8,256], index: 3, kind: output, shape index: {}]  }
   0x1   :  { %v17_v0 = vld [vmem:[%s228_s0] sm:$0xff]  ;;  %162 = vset.pattern.permute.xlu0 %v189_v1 }
   0x2   :  { %24 = vst [vmem:[#allocation1] ss:$2 sm:$0xff] %v17_v0  ;;  %v16_v2 = vld [vmem:[%s230_s2] sm:$0xff] }
   0x3   :  { %8 = vsyncpa [#allocation3], 0  ;;  %20 = vperm.xlu0 %162, %v16_v2   ;;  %v153_v3 = vld [vmem:[%s228_s0 + $0x8] sm:$0xff]  ;;  %vm31_vm0 = vcmask 1043456   ;;  %v15_v6 = vld [vmem:[%s229_s1] sm:$0xff]  ;;  %vm27_vm1 = vcmask 31744  }
   0x4   :  { %s190_s0 = smov [#allocation2]   ;;  %s137_s21 = sshll.u32 %s231_s3, 4  ;;  %s138_s21 = int_to_ptr.hbm [resolvable:$true] %s137_s21 }
   0x5   :  { %s135_s1 = sshll.u32 %s190_s0, 4  ;;  %s191_s22 = smov 256   ;;  %s136_s1 = int_to_ptr.vmem [resolvable:$true] %s135_s1 }
   0x6   :  { %s192_s23 = smov 16  }
   0x9   :  { %v25_v4 = vld.sshfl [vmem:[#allocation1] sm:$0xff pattern:$0x75316420]  ;;  %v26_v5 = vld.sshfl [vmem:[#allocation1 + $0x8] sm:$0xff pattern:$0x75316420] }
   0xa   :  { %81 = vst [vmem:[#allocation1] ss:$2 sm:$0xff] %v153_v3  ;;  %149 = vmatpush.msk.msra.mxu0 %vm31_vm0, %v25_v4  ;;  %151 = vmatpush.msk.msra.mxu1 %vm31_vm0, %v26_v5 }
   0xb   :  { %150 = vmatmul.msk.f32.vlgmr.msra.gmra.mxu0 %vm27_vm1, %v15_v6  ;;  %152 = vmatmul.msk.f32.vlgmr.msra.gmra.mxu1 %vm27_vm1, %v15_v6 }
  0x11   :  { %v82_v7 = vld.sshfl [vmem:[#allocation1] sm:$0xff pattern:$0x75316420]  ;;  %v83_v8 = vld.sshfl [vmem:[#allocation1 + $0x8] sm:$0xff pattern:$0x75316420] }
  0x12   :  { %154 = vmatpush.msk.msra.mxu2 %vm31_vm0, %v82_v7  ;;  %156 = vmatpush.msk.msra.mxu3 %vm31_vm0, %v83_v8 }
  0x13   :  { %155 = vmatmul.msk.f32.vlgmr.msra.gmra.mxu2 %vm27_vm1, %v15_v6  ;;  %157 = vmatmul.msk.f32.vlgmr.msra.gmra.mxu3 %vm27_vm1, %v15_v6 }
  0x75   :  { %v21_v9 = vpop.permute.xlu0 %20 }
  0x88   :  { %v53_v10 = vpop.f32.mrf.mxu0  ;;  %v73_v11 = vpop.f32.mrf.mxu1 }
  0x89   :  { %v54_v12 = vadd.f32 %v53_v10, %v21_v9  ;;  %v74_v13 = vadd.f32 %v73_v11, %v21_v9 }
  0x8b   :  { %76 = vst [vmem:[#allocation2] sm:$0xff] %v54_v12 }
  0x8c   :  { %77 = vst [vmem:[#allocation2 + $0x8] sm:$0xff] %v74_v13 }
  0x96   :  { %v105_v14 = vpop.f32.mrf.mxu2  ;;  %v125_v15 = vpop.f32.mrf.mxu3 }
  0x97   :  { %v106_v16 = vadd.f32 %v105_v14, %v21_v9  ;;  %v126_v17 = vadd.f32 %v125_v15, %v21_v9 }
  0x99   :  { %129 = vst [vmem:[#allocation2 + $0x10] sm:$0xff] %v106_v16 }
  0x9a   :  { %130 = vst [vmem:[#allocation2 + $0x18] sm:$0xff] %v126_v17 }
  0x9b   :  { %143 = dma.vmem_to_hbm [thread:$0]  %s136_s1, 512, %s138_s21, [#allocation3], %s191_s22, %s191_s22, %s192_s23  }
  0x9c   :  { %187 = dma.done.wait [#allocation3], 512  }
  0x9d   :  { %188 = vsyncadd [#allocation3], 4294966784 }
  0x9e   :  { %148 = vsyncpa [#allocation3], 1 }

// kernel: tpu_custom_call.1
= control target key start
LH: loop header
LB: loop body
LE: loop exit
PB: predicated region body
PF: predicated region fallthrough
CT: control target
= control target key end

     0   :  { %v189_v1 = vmov 0   ;;  %s228_s0 = inlined_call_operand.vmem [shape: f32[2,4,256], index: 0, kind: input, shape index: {}]   ;;  %s229_s1 = inlined_call_operand.vmem [shape: f32[8,4], index: 1, kind: input, shape index: {}]   ;;  %s230_s2 = inlined_call_operand.vmem [shape: f32[8,1], index: 2, kind: input, shape index: {}]   ;;  %s231_s3 = inlined_call_operand.hbm [shape: f32[2,8,256], index: 3, kind: output, shape index: {}]  }
   0x1   :  { %v17_v0 = vld [vmem:[%s228_s0] sm:$0xff]  ;;  %162 = vset.pattern.permute.xlu0 %v189_v1 }
   0x2   :  { %24 = vst [vmem:[#allocation1] ss:$2 sm:$0xff] %v17_v0  ;;  %v16_v2 = vld [vmem:[%s230_s2] sm:$0xff] }
   0x3   :  { %8 = vsyncpa [#allocation3], 0  ;;  %20 = vperm.xlu0 %162, %v16_v2   ;;  %v153_v3 = vld [vmem:[%s228_s0 + $0x8] sm:$0xff]  ;;  %vm31_vm0 = vcmask 1043456   ;;  %v15_v6 = vld [vmem:[%s229_s1] sm:$0xff]  ;;  %vm27_vm1 = vcmask 31744  }
   0x4   :  { %s190_s0 = smov [#allocation2]   ;;  %s137_s21 = sshll.u32 %s231_s3, 4  ;;  %s138_s21 = int_to_ptr.hbm [resolvable:$true] %s137_s21 }
   0x5   :  { %s135_s1 = sshll.u32 %s190_s0, 4  ;;  %s191_s22 = smov 256   ;;  %s136_s1 = int_to_ptr.vmem [resolvable:$true] %s135_s1 }
   0x6   :  { %s192_s23 = smov 16  }
   0x9   :  { %v25_v4 = vld.sshfl [vmem:[#allocation1] sm:$0xff pattern:$0x75316420]  ;;  %v26_v5 = vld.sshfl [vmem:[#allocation1 + $0x8] sm:$0xff pattern:$0x75316420] }
   0xa   :  { %81 = vst [vmem:[#allocation1] ss:$2 sm:$0xff] %v153_v3  ;;  %149 = vmatpush.msk.msra.mxu0 %vm31_vm0, %v25_v4  ;;  %151 = vmatpush.msk.msra.mxu1 %vm31_vm0, %v26_v5 }
   0xb   :  { %150 = vmatmul.msk.f32.vlgmr.msra.gmra.mxu0 %vm27_vm1, %v15_v6  ;;  %152 = vmatmul.msk.f32.vlgmr.msra.gmra.mxu1 %vm27_vm1, %v15_v6 }
  0x11   :  { %v82_v7 = vld.sshfl [vmem:[#allocation1] sm:$0xff pattern:$0x75316420]  ;;  %v83_v8 = vld.sshfl [vmem:[#allocation1 + $0x8] sm:$0xff pattern:$0x75316420] }
  0x12   :  { %154 = vmatpush.msk.msra.mxu2 %vm31_vm0, %v82_v7  ;;  %156 = vmatpush.msk.msra.mxu3 %vm31_vm0, %v83_v8 }
  0x13   :  { %155 = vmatmul.msk.f32.vlgmr.msra.gmra.mxu2 %vm27_vm1, %v15_v6  ;;  %157 = vmatmul.msk.f32.vlgmr.msra.gmra.mxu3 %vm27_vm1, %v15_v6 }
  0x75   :  { %v21_v9 = vpop.permute.xlu0 %20 }
  0x88   :  { %v53_v10 = vpop.f32.mrf.mxu0  ;;  %v73_v11 = vpop.f32.mrf.mxu1 }
  0x89   :  { %v54_v12 = vadd.f32 %v53_v10, %v21_v9  ;;  %v74_v13 = vadd.f32 %v73_v11, %v21_v9 }
  0x8b   :  { %76 = vst [vmem:[#allocation2] sm:$0xff] %v54_v12 }
  0x8c   :  { %77 = vst [vmem:[#allocation2 + $0x8] sm:$0xff] %v74_v13 }
  0x96   :  { %v105_v14 = vpop.f32.mrf.mxu2  ;;  %v125_v15 = vpop.f32.mrf.mxu3 }
  0x97   :  { %v106_v16 = vadd.f32 %v105_v14, %v21_v9  ;;  %v126_v17 = vadd.f32 %v125_v15, %v21_v9 }
  0x99   :  { %129 = vst [vmem:[#allocation2 + $0x10] sm:$0xff] %v106_v16 }
  0x9a   :  { %130 = vst [vmem:[#allocation2 + $0x18] sm:$0xff] %v126_v17 }
  0x9b   :  { %143 = dma.vmem_to_hbm [thread:$0]  %s136_s1, 512, %s138_s21, [#allocation3], %s191_s22, %s191_s22, %s192_s23  }
  0x9c   :  { %187 = dma.done.wait [#allocation3], 512  }
  0x9d   :  { %188 = vsyncadd [#allocation3], 4294966784 }
  0x9e   :  { %148 = vsyncpa [#allocation3], 1 }

</bundles_post_ra>
